<compile_context>
chip_gen: v5e
topology: v5e:2x2
jax: 0.10.0
libtpu: 0.0.40
codegen_flags: <defaults>
</compile_context>

<pallas_src>
import functools

import jax
import jax.numpy as jnp
import numpy as np
from jax.experimental import pallas as pl
from jax.experimental.pallas import tpu as pltpu


def _kv_kernel(x_ref, w_ref, b_ref, m_ref, ko_ref, vo_ref, *, H, W):
    # x_ref : (bblk*Cin, HW)                 input slab, rows = (image, in-channel)
    # w_ref : (bblk*(Ck+Cv), 9*bblk*Cin)     block-diagonal, tap-major fused K+V weights
    # b_ref : (bblk*(Ck+Cv), 1)              fused bias column (broadcast over lanes)
    # m_ref : (9, HW)                        0/1 halo multipliers per tap
    # ko_ref: (bblk*Ck, HW)                  key output slab   (lane-dense last dim)
    # vo_ref: (bblk*Cv, HW)                  value output slab (lane-dense last dim)
    HW = H * W
    xs = x_ref[...]
    masks = m_ref[...]

    # Build all 9 tap patches once for the whole slab.  Roll acts independently per
    # row (one image plane per row), so it never mixes images/channels; the mask
    # zeroes exactly the conv's zero-padding halo (which is also where the circular
    # wrap lands), matching a padding=1 conv.
    patches = []
    for ky in range(3):
        for kx in range(3):
            tap = ky * 3 + kx
            off = (ky - 1) * W + (kx - 1)
            p = xs if off == 0 else pltpu.roll(xs, shift=(-off) % HW, axis=1)
            if not (ky == 1 and kx == 1):          # center tap needs no halo mask
                p = p * masks[tap:tap + 1, :]
            patches.append(p)

    # Sublane-aligned stack: (9*bblk*Cin, HW); rows ordered (tap, image, in-channel).
    p_all = jnp.concatenate(patches, axis=0)

    # Single fused MXU contraction for the whole batch block, both convs, all taps.
    acc = jnp.dot(w_ref[...], p_all, preferred_element_type=jnp.float32)
    acc = acc + b_ref[...]

    nk = ko_ref.shape[0]                            # = bblk*Ck
    ko_ref[...] = acc[:nk].astype(ko_ref.dtype)
    vo_ref[...] = acc[nk:].astype(vo_ref.dtype)


def _build_tap_masks(H, W):
    """(9, H*W) float32 0/1 multipliers: 1 where tap (ky,kx) reads an in-image pixel."""
    HW = H * W
    y = np.arange(HW) // W
    x = np.arange(HW) % W
    masks = np.ones((9, HW), np.float32)
    for ky in range(3):
        for kx in range(3):
            valid = np.ones(HW, bool)
            if ky == 0:
                valid &= y >= 1
            if ky == 2:
                valid &= y <= H - 2
            if kx == 0:
                valid &= x >= 1
            if kx == 2:
                valid &= x <= W - 2
            masks[ky * 3 + kx] = valid.astype(np.float32)
    return jnp.asarray(masks)


def _build_fused_params(wk, bk, wv, bv, bblk):
    """Block-diagonal fused weights (bblk*(Ck+Cv), 9*bblk*Cin) and bias (.,1).

    Output rows: [b*Ck + ok for b, ok] then [b*Cv + ov for b, ov].
    Contraction cols: t*(bblk*Cin) + b*Cin + c, matching the in-kernel patch stack.
    """
    Ck, Cin = wk.shape[0], wk.shape[1]
    Cv = wv.shape[0]
    wk_t = jnp.transpose(wk, (2, 3, 0, 1)).reshape(9, Ck, Cin)   # (tap, ok, cin)
    wv_t = jnp.transpose(wv, (2, 3, 0, 1)).reshape(9, Cv, Cin)
    eye_b = jnp.eye(bblk, dtype=wk.dtype)
    wk_big = jnp.einsum("bB,tkc->bktBc", eye_b, wk_t).reshape(bblk * Ck, 9 * bblk * Cin)
    wv_big = jnp.einsum("bB,tvc->bvtBc", eye_b, wv_t).reshape(bblk * Cv, 9 * bblk * Cin)
    w_big = jnp.concatenate([wk_big, wv_big], axis=0)
    b_big = jnp.concatenate([jnp.tile(bk, bblk), jnp.tile(bv, bblk)]).reshape(-1, 1)
    return w_big, b_big


def _pick_batch_block(n, cin, ck, cv, hw, max_blk=16, min_step_out_bytes=128 * 1024):
    """Images per grid step.

    Prefer an even number (>=2) of reasonably sized, (8,128)-tile-aligned steps so the
    "parallel" grid axis shards evenly over v7x's two TensorCores.  Otherwise take the
    largest legal block (a single full-batch step is always legal and is optimal on
    single-TC v5e/v6e).  max_blk bounds the O(bblk^2) block-diagonal weight in VMEM.
    """
    def aligned(d):
        return (d * cin) % 8 == 0 and (d * ck) % 8 == 0 and (d * cv) % 8 == 0

    divs = [d for d in range(1, min(n, max_blk) + 1) if n % d == 0]
    per_image_out_bytes = (ck + cv) * hw * 4
    cands = [d for d in divs
             if (n // d) >= 2 and (n // d) % 2 == 0 and aligned(d)
             and d * per_image_out_bytes >= min_step_out_bytes]
    if cands:
        return max(cands)
    legal = [d for d in divs if (n // d) == 1 or aligned(d)]
    return max(legal) if legal else n   # fallback: one step over the whole batch


def key_value_forward(x_nchw, wk_oihw, bk, wv_oihw, bv):
    """Equivalent of KeyValue.forward: returns (key, value) in NCHW, like the PyTorch module."""
    N, Cin, H, W = x_nchw.shape
    Ck = wk_oihw.shape[0]
    Cv = wv_oihw.shape[0]
    HW = H * W

    bblk = _pick_batch_block(N, Cin, Ck, Cv, HW)
    nsteps = N // bblk

    # Layout-free glue: NCHW -> (N*Cin, HW) is a contiguous reshape (no transpose).
    x_flat = x_nchw.reshape(N * Cin, HW)
    w_big, b_big = _build_fused_params(wk_oihw, bk, wv_oihw, bv, bblk)
    masks = _build_tap_masks(H, W)

    kernel = functools.partial(_kv_kernel, H=H, W=W)
    ko, vo = pl.pallas_call(
        kernel,
        out_shape=(
            jax.ShapeDtypeStruct((N * Ck, HW), jnp.float32),
            jax.ShapeDtypeStruct((N * Cv, HW), jnp.float32),
        ),
        grid_spec=pltpu.PrefetchScalarGridSpec(
            num_scalar_prefetch=0,
            grid=(nsteps,),
            in_specs=[
                pl.BlockSpec((bblk * Cin, HW), lambda i: (i, 0)),
                pl.BlockSpec((bblk * (Ck + Cv), 9 * bblk * Cin), lambda i: (0, 0)),
                pl.BlockSpec((bblk * (Ck + Cv), 1), lambda i: (0, 0)),
                pl.BlockSpec((9, HW), lambda i: (0, 0)),
            ],
            out_specs=[
                pl.BlockSpec((bblk * Ck, HW), lambda i: (i, 0)),
                pl.BlockSpec((bblk * Cv, HW), lambda i: (i, 0)),
            ],
        ),
        compiler_params=pltpu.CompilerParams(
            dimension_semantics=("parallel",),
        ),
    )(x_flat, w_big, b_big, masks)

    # Free contiguous reshapes back to NCHW images.
    return ko.reshape(N, Ck, H, W), vo.reshape(N, Cv, H, W)


def _reference_conv_nchw(x, w, b):
    out = jax.lax.conv_general_dilated(
        x, w, window_strides=(1, 1), padding=((1, 1), (1, 1)),
        dimension_numbers=("NCHW", "OIHW", "NCHW"),
        precision=jax.lax.Precision.HIGHEST)
    return out + b.reshape(1, -1, 1, 1)


if __name__ == "__main__":
    # Small shapes consistent with the module: indim=4, keydim=8, valdim=16.
    N, Cin, H, W = 2, 4, 16, 16
    keydim, valdim = 8, 16

    key = jax.random.PRNGKey(0)
    k0, k1, k2, k3, k4 = jax.random.split(key, 5)

    x = jax.random.normal(k0, (N, Cin, H, W), dtype=jnp.float32)

    # Deterministic parameter init (PyTorch conv default: uniform(-b, b), b = 1/sqrt(fan_in)).
    fan_in = Cin * 3 * 3
    bound = 1.0 / np.sqrt(fan_in)
    wk = jax.random.uniform(k1, (keydim, Cin, 3, 3), jnp.float32, -bound, bound)
    bk = jax.random.uniform(k2, (keydim,), jnp.float32, -bound, bound)
    wv = jax.random.uniform(k3, (valdim, Cin, 3, 3), jnp.float32, -bound, bound)
    bv = jax.random.uniform(k4, (valdim,), jnp.float32, -bound, bound)

    key_out, val_out = key_value_forward(x, wk, bk, wv, bv)
    jax.block_until_ready((key_out, val_out))

    # Correctness check against XLA's conv (same semantics as nn.Conv2d).
    key_ref = _reference_conv_nchw(x, wk, bk)
    val_ref = _reference_conv_nchw(x, wv, bv)
    np.testing.assert_allclose(np.asarray(key_out), np.asarray(key_ref),
                               rtol=1e-4, atol=1e-4)
    np.testing.assert_allclose(np.asarray(val_out), np.asarray(val_ref),
                               rtol=1e-4, atol=1e-4)

    print("KERNEL_OK")
</pallas_src>

<mosaic_0001>
module attributes {stable_mosaic.version = 11 : i64} {
  func.func @_kv_kernel(%arg0: i32, %arg1: memref<8x256xf32, #tpu.memory_space<vmem>>, %arg2: memref<48x72xf32, #tpu.memory_space<vmem>>, %arg3: memref<48x1xf32, #tpu.memory_space<vmem>>, %arg4: memref<9x256xf32, #tpu.memory_space<vmem>>, %arg5: memref<16x256xf32, #tpu.memory_space<vmem>>, %arg6: memref<32x256xf32, #tpu.memory_space<vmem>>) attributes {dimension_semantics = [#tpu.dimension_semantics<parallel>], iteration_bounds = array<i64: 1>, scalar_prefetch = 0 : i64, scratch_operands = 0 : i64, tpu.core_type = #tpu.core_type<tc>, window_params = [{transform_indices = @transform_0, window_bounds = array<i64: 8, 256>}, {pipeline_mode = #tpu.pipeline_mode<synchronous>, transform_indices = @transform_1, window_bounds = array<i64: 48, 72>}, {pipeline_mode = #tpu.pipeline_mode<synchronous>, transform_indices = @transform_2, window_bounds = array<i64: 48, 1>}, {pipeline_mode = #tpu.pipeline_mode<synchronous>, transform_indices = @transform_3, window_bounds = array<i64: 9, 256>}, {transform_indices = @transform_4, window_bounds = array<i64: 16, 256>}, {transform_indices = @transform_5, window_bounds = array<i64: 32, 256>}]} {
    %c0 = arith.constant 0 : index
    %c0_0 = arith.constant 0 : index
    %0 = vector.load %arg1[%c0, %c0_0] : memref<8x256xf32, #tpu.memory_space<vmem>>, vector<8x256xf32>
    %c0_1 = arith.constant 0 : index
    %c0_2 = arith.constant 0 : index
    %1 = vector.load %arg4[%c0_1, %c0_2] : memref<9x256xf32, #tpu.memory_space<vmem>>, vector<9x256xf32>
    %c17_i32 = arith.constant 17 : i32
    %2 = tpu.dynamic_rotate %0 by %c17_i32 dim 1 : vector<8x256xf32>, i32 -> vector<8x256xf32>
    %3 = vector.extract_strided_slice %1 {offsets = [0, 0], sizes = [1, 256], strides = [1, 1]} : vector<9x256xf32> to vector<1x256xf32>
    %4 = vector.broadcast %3 : vector<1x256xf32> to vector<8x256xf32>
    %5 = arith.mulf %2, %4 : vector<8x256xf32>
    %c16_i32 = arith.constant 16 : i32
    %6 = tpu.dynamic_rotate %0 by %c16_i32 dim 1 : vector<8x256xf32>, i32 -> vector<8x256xf32>
    %7 = vector.extract_strided_slice %1 {offsets = [1, 0], sizes = [1, 256], strides = [1, 1]} : vector<9x256xf32> to vector<1x256xf32>
    %8 = vector.broadcast %7 : vector<1x256xf32> to vector<8x256xf32>
    %9 = arith.mulf %6, %8 : vector<8x256xf32>
    %c15_i32 = arith.constant 15 : i32
    %10 = tpu.dynamic_rotate %0 by %c15_i32 dim 1 : vector<8x256xf32>, i32 -> vector<8x256xf32>
    %11 = vector.extract_strided_slice %1 {offsets = [2, 0], sizes = [1, 256], strides = [1, 1]} : vector<9x256xf32> to vector<1x256xf32>
    %12 = vector.broadcast %11 : vector<1x256xf32> to vector<8x256xf32>
    %13 = arith.mulf %10, %12 : vector<8x256xf32>
    %c1_i32 = arith.constant 1 : i32
    %14 = tpu.dynamic_rotate %0 by %c1_i32 dim 1 : vector<8x256xf32>, i32 -> vector<8x256xf32>
    %15 = vector.extract_strided_slice %1 {offsets = [3, 0], sizes = [1, 256], strides = [1, 1]} : vector<9x256xf32> to vector<1x256xf32>
    %16 = vector.broadcast %15 : vector<1x256xf32> to vector<8x256xf32>
    %17 = arith.mulf %14, %16 : vector<8x256xf32>
    %c255_i32 = arith.constant 255 : i32
    %18 = tpu.dynamic_rotate %0 by %c255_i32 dim 1 : vector<8x256xf32>, i32 -> vector<8x256xf32>
    %19 = vector.extract_strided_slice %1 {offsets = [5, 0], sizes = [1, 256], strides = [1, 1]} : vector<9x256xf32> to vector<1x256xf32>
    %20 = vector.broadcast %19 : vector<1x256xf32> to vector<8x256xf32>
    %21 = arith.mulf %18, %20 : vector<8x256xf32>
    %c241_i32 = arith.constant 241 : i32
    %22 = tpu.dynamic_rotate %0 by %c241_i32 dim 1 : vector<8x256xf32>, i32 -> vector<8x256xf32>
    %23 = vector.extract_strided_slice %1 {offsets = [6, 0], sizes = [1, 256], strides = [1, 1]} : vector<9x256xf32> to vector<1x256xf32>
    %24 = vector.broadcast %23 : vector<1x256xf32> to vector<8x256xf32>
    %25 = arith.mulf %22, %24 : vector<8x256xf32>
    %c240_i32 = arith.constant 240 : i32
    %26 = tpu.dynamic_rotate %0 by %c240_i32 dim 1 : vector<8x256xf32>, i32 -> vector<8x256xf32>
    %27 = vector.extract_strided_slice %1 {offsets = [7, 0], sizes = [1, 256], strides = [1, 1]} : vector<9x256xf32> to vector<1x256xf32>
    %28 = vector.broadcast %27 : vector<1x256xf32> to vector<8x256xf32>
    %29 = arith.mulf %26, %28 : vector<8x256xf32>
    %c239_i32 = arith.constant 239 : i32
    %30 = tpu.dynamic_rotate %0 by %c239_i32 dim 1 : vector<8x256xf32>, i32 -> vector<8x256xf32>
    %31 = vector.extract_strided_slice %1 {offsets = [8, 0], sizes = [1, 256], strides = [1, 1]} : vector<9x256xf32> to vector<1x256xf32>
    %32 = vector.broadcast %31 : vector<1x256xf32> to vector<8x256xf32>
    %33 = arith.mulf %30, %32 : vector<8x256xf32>
    %34 = tpu.concatenate %5, %9, %13, %17, %0, %21, %25, %29, %33 in 0 : vector<8x256xf32>, vector<8x256xf32>, vector<8x256xf32>, vector<8x256xf32>, vector<8x256xf32>, vector<8x256xf32>, vector<8x256xf32>, vector<8x256xf32>, vector<8x256xf32> -> vector<72x256xf32>
    %c0_3 = arith.constant 0 : index
    %c0_4 = arith.constant 0 : index
    %35 = vector.load %arg2[%c0_3, %c0_4] : memref<48x72xf32, #tpu.memory_space<vmem>>, vector<48x72xf32>
    %cst = arith.constant dense<0.000000e+00> : vector<48x256xf32>
    %36 = tpu.matmul %35, %34, %cst {dimension_numbers = #tpu.dot_dimension_numbers<[1], [0], [0], [1], [0, 0, 1, 1], [], []>} : vector<48x72xf32>, vector<72x256xf32>, vector<48x256xf32> -> vector<48x256xf32>
    %c0_5 = arith.constant 0 : index
    %c0_6 = arith.constant 0 : index
    %37 = vector.load %arg3[%c0_5, %c0_6] : memref<48x1xf32, #tpu.memory_space<vmem>>, vector<48x1xf32>
    %38 = vector.broadcast %37 : vector<48x1xf32> to vector<48x256xf32>
    %39 = arith.addf %36, %38 : vector<48x256xf32>
    %40 = vector.extract_strided_slice %39 {offsets = [0, 0], sizes = [16, 256], strides = [1, 1]} : vector<48x256xf32> to vector<16x256xf32>
    %c0_7 = arith.constant 0 : index
    %c0_8 = arith.constant 0 : index
    %41 = vector.load %arg5[%c0_7, %c0_8] : memref<16x256xf32, #tpu.memory_space<vmem>>, vector<16x256xf32>
    tpu.vector_store %arg5[%c0_7, %c0_8], %40 {strides = array<i32>} : memref<16x256xf32, #tpu.memory_space<vmem>>, vector<16x256xf32>,
    %42 = vector.extract_strided_slice %39 {offsets = [16, 0], sizes = [32, 256], strides = [1, 1]} : vector<48x256xf32> to vector<32x256xf32>
    %c0_9 = arith.constant 0 : index
    %c0_10 = arith.constant 0 : index
    %43 = vector.load %arg6[%c0_9, %c0_10] : memref<32x256xf32, #tpu.memory_space<vmem>>, vector<32x256xf32>
    tpu.vector_store %arg6[%c0_9, %c0_10], %42 {strides = array<i32>} : memref<32x256xf32, #tpu.memory_space<vmem>>, vector<32x256xf32>,
    return
  }
  func.func @transform_0(%arg0: i32) -> (i32, i32) {
    %c0_i32 = arith.constant 0 : i32
    %c0_i32_0 = arith.constant 0 : i32
    return %arg0, %c0_i32 : i32, i32
  }
  func.func @transform_1(%arg0: i32) -> (i32, i32) {
    %c0_i32 = arith.constant 0 : i32
    %c0_i32_0 = arith.constant 0 : i32
    %c0_i32_1 = arith.constant 0 : i32
    return %c0_i32, %c0_i32_0 : i32, i32
  }
  func.func @transform_2(%arg0: i32) -> (i32, i32) {
    %c0_i32 = arith.constant 0 : i32
    %c0_i32_0 = arith.constant 0 : i32
    %c0_i32_1 = arith.constant 0 : i32
    return %c0_i32, %c0_i32_0 : i32, i32
  }
  func.func @transform_3(%arg0: i32) -> (i32, i32) {
    %c0_i32 = arith.constant 0 : i32
    %c0_i32_0 = arith.constant 0 : i32
    %c0_i32_1 = arith.constant 0 : i32
    return %c0_i32, %c0_i32_0 : i32, i32
  }
  func.func @transform_4(%arg0: i32) -> (i32, i32) {
    %c0_i32 = arith.constant 0 : i32
    %c0_i32_0 = arith.constant 0 : i32
    return %arg0, %c0_i32 : i32, i32
  }
  func.func @transform_5(%arg0: i32) -> (i32, i32) {
    %c0_i32 = arith.constant 0 : i32
    %c0_i32_0 = arith.constant 0 : i32
    return %arg0, %c0_i32 : i32, i32
  }
}

</mosaic_0001>

<bundles_post_ra>
// kernel: tpu_custom_call.1
= control target key start
LH: loop header
LB: loop body
LE: loop exit
PB: predicated region body
PF: predicated region fallthrough
CT: control target
= control target key end

     0   :  { %11 = vsyncpa [#allocation3], 0  ;;  %s648_s0 = inlined_call_operand.hbm [shape: f32[8,256], index: 0, kind: input, shape index: {}]   ;;  %s649_s1 = inlined_call_operand.vmem [shape: f32[48,72], index: 1, kind: input, shape index: {}]   ;;  %s650_s2 = inlined_call_operand.vmem [shape: f32[48,1], index: 2, kind: input, shape index: {}]   ;;  %s651_s3 = inlined_call_operand.hbm [shape: f32[9,256], index: 3, kind: input, shape index: {}]   ;;  %s652_s4 = inlined_call_operand.hbm [shape: f32[16,256], index: 4, kind: output, shape index: {0}]   ;;  %s653_s5 = inlined_call_operand.hbm [shape: f32[32,256], index: 5, kind: output, shape index: {1}]  }
   0x1   :  { %12 = vsyncpa [#allocation6], 0 }
   0x2   :  { %13 = vsyncpa [#allocation4], 0 }
   0x3   :  { %14 = vsyncpa [#allocation9], 0  ;;  %s20_s20 = sshll.u32 %s648_s0, 4  ;;  %s481_s21 = smov [#allocation2]   ;;  %s21_s20 = int_to_ptr.hbm [resolvable:$true] %s20_s20 }
   0x4   :  { %s22_s22 = sshll.u32 %s481_s21, 4  ;;  %s34_s25 = sshll.u32 %s651_s3, 4  ;;  %s23_s22 = int_to_ptr.vmem [resolvable:$true] %s22_s22  ;;  %s35_s25 = int_to_ptr.hbm [resolvable:$true] %s34_s25 }
   0x5   :  { %25 = dma.hbm_to_vmem [thread:$0]  %s21_s20, 256, %s23_s22, [#allocation3]  }
   0x6   :  { %s482_s26 = smov [#allocation5]   ;;  %s483_s28 = smov 256  }
   0x7   :  { %s36_s27 = sshll.u32 %s482_s26, 4  ;;  %s484_s29 = smov 16   ;;  %s37_s27 = int_to_ptr.vmem [resolvable:$true] %s36_s27 }
   0x8   :  { %42 = dma.hbm_to_vmem [thread:$0]  %s35_s25, 512, %s37_s27, [#allocation6], %s483_s28, %s483_s28, %s484_s29  }
   0x9   :  { %473 = dma.done.wait [#allocation3], 256  }
   0xa   :  { %474 = vsyncadd [#allocation3], 4294967040 }
   0xb   :  { %475 = dma.done.wait [#allocation6], 512  }
   0xc   :  { %476 = vsyncadd [#allocation6], 4294966784  ;;  %v534_v0 = vld [vmem:[#allocation2] sm:$0xff]  ;;  %s485_s0 = smov 112   ;;  %s486_s3 = smov 111   ;;  %v539_v1 = vld [vmem:[#allocation2 + $0x8] sm:$0xff]  ;;  %v61_v3 = vlaneseq }
   0xd   :  { %125 = vrot.lane.b32.xlu1 %v534_v0, %s485_s0  ;;  %136 = vrot.lane.b32.xlu0 %v534_v0, %s486_s3  ;;  %s487_s30 = smov 113   ;;  %s488_s6 = smov 127   ;;  %v559_v8 = vld [vmem:[#allocation5] sm:$0xff]  ;;  %v375_v9 = vld [vmem:[#allocation5 + $0x10] ss:$0 sm:$0xff]  ;;  %v562_v11 = vld [vmem:[#allocation5 + $0x8] sm:$0xff] }
   0xe   :  { %114 = vrot.lane.b32.xlu2 %v534_v0, %s487_s30  ;;  %s489_s7 = smov 1   ;;  %s490_s8 = smov 15   ;;  %v556_v6 = vand.u32 127, %v61_v3  ;;  %v376_v10 = vld [vmem:[#allocation5 + $0x18] ss:$0 sm:$0xff]  ;;  %v132_v14 = vperm.slane %v559_v8, 7 }
   0xf   :  { %s491_s9 = smov 17   ;;  %v133_v18 = vperm.slane %v562_v11, 7  ;;  %v121_v22 = vperm.slane %v559_v8, 6  ;;  %v122_v24 = vperm.slane %v562_v11, 6  ;;  %v110_v30 = vperm.slane %v559_v8, 5  ;;  %v153_v35 = vld [vmem:[%s650_s2] sm:$0xff] }
  0x10   :  { %vm129_vm0 = vcmp.lt.s32.totalorder %v556_v6, 112  ;;  %vm140_vm1 = vcmp.lt.s32.totalorder %v556_v6, 111  ;;  %vm118_vm2 = vcmp.lt.s32.totalorder %v556_v6, 113  ;;  %vm107_vm3 = vcmp.lt.s32.totalorder %v556_v6, 127  ;;  %v156_v48 = vld [vmem:[%s650_s2 + $0x18] sm:$0xff]  ;;  %v155_v59 = vld [vmem:[%s650_s2 + $0x10] sm:$0xff] }
  0x11   :  { %v111_v31 = vperm.slane %v562_v11, 5  ;;  %v492_v40 = vmov 0   ;;  %vm96_vm4 = vcmp.lt.s32.totalorder %v556_v6, 1  ;;  %v99_v41 = vperm.slane %v559_v8, 3  ;;  %v154_v60 = vld [vmem:[%s650_s2 + $0x8] sm:$0xff]  ;;  %s296_s11 = sshll.u32 %s652_s4, 4  ;;  %s297_s11 = int_to_ptr.hbm [resolvable:$true] %s296_s11 }
  0x12   :  { %372 = vset.pattern.permute.xlu1 %v492_v40  ;;  %374 = vset.pattern.permute.xlu0 %v492_v40  ;;  %v100_v42 = vperm.slane %v562_v11, 3  ;;  %vm85_vm5 = vcmp.lt.s32.totalorder %v556_v6, 15  ;;  %v88_v44 = vperm.slane %v559_v8, 2  ;;  %v89_v45 = vperm.slane %v562_v11, 2  ;;  %v158_v63 = vld [vmem:[%s650_s2 + $0x28] sm:$0xff]  ;;  %s494_s4 = smov [#allocation8]  }
  0x13   :  { %373 = vset.pattern.permute.xlu2 %v492_v40  ;;  %vm74_vm6 = vcmp.lt.s32.totalorder %v556_v6, 16  ;;  %v77_v57 = vperm.slane %v559_v8, 1  ;;  %v78_v58 = vperm.slane %v562_v11, 1  ;;  %vm63_vm7 = vcmp.lt.s32.totalorder %v556_v6, 17  ;;  %v147_v6 = vld [vmem:[%s649_s1] sm:$0xff]  ;;  %s307_s12 = sshll.u32 %s494_s4, 4  ;;  %s308_s12 = int_to_ptr.vmem [resolvable:$true] %s307_s12 }
  0x14   :  { %vm189_vm8 = vcmask 588800   ;;  %s309_s15 = sshll.u32 %s653_s5, 4  ;;  %s310_s15 = int_to_ptr.hbm [resolvable:$true] %s309_s15 }
  0x15   :  { %127 = vrot.lane.b32.xlu1 %v539_v1, %s485_s0  ;;  %138 = vrot.lane.b32.xlu0 %v539_v1, %s486_s3 }
  0x16   :  { %116 = vrot.lane.b32.xlu2 %v539_v1, %s487_s30 }
  0x1d   :  { %105 = vrot.lane.b32.xlu1 %v539_v1, %s488_s6  ;;  %103 = vrot.lane.b32.xlu0 %v534_v0, %s488_s6 }
  0x1e   :  { %92 = vrot.lane.b32.xlu2 %v534_v0, %s489_s7 }
  0x25   :  { %81 = vrot.lane.b32.xlu1 %v534_v0, %s490_s8  ;;  %94 = vrot.lane.b32.xlu0 %v539_v1, %s489_s7 }
  0x26   :  { %83 = vrot.lane.b32.xlu2 %v539_v1, %s490_s8 }
  0x2d   :  { %72 = vrot.lane.b32.xlu1 %v539_v1, %s484_s29  ;;  %70 = vrot.lane.b32.xlu0 %v534_v0, %s484_s29 }
  0x2e   :  { %57 = vrot.lane.b32.xlu2 %v534_v0, %s491_s9 }
  0x35   :  { %59 = vrot.lane.b32.xlu0 %v539_v1, %s491_s9  ;;  %161 = vperm.xlu1 %372, %v153_v35  }
  0x36   :  { %166 = vperm.xlu2 %373, %v154_v60  }
  0x3d   :  { %176 = vperm.xlu1 %372, %v156_v48   ;;  %171 = vperm.xlu0 %374, %v155_v59  }
  0x45   :  { %186 = vperm.xlu1 %372, %v158_v63  }
  0x68   :  { %v115_v2 = vpop.permute.xlu2 %114 }
  0x70   :  { %v117_v7 = vpop.permute.xlu2 %116 }
  0x71   :  { %v119_v23 = vsel %vm118_vm2, %v115_v2, %v117_v7  ;;  %v120_v25 = vsel %vm118_vm2, %v117_v7, %v115_v2  ;;  %v66_v7 = vperm.slane %v559_v8, 0  ;;  %v151_v8 = vld [vmem:[%s649_s1 + $0x20] sm:$0xff] }
  0x72   :  { %v123_v29 = vmul.f32 %v121_v22, %v119_v23  ;;  %v124_v32 = vmul.f32 %v122_v24, %v120_v25 }
  0x78   :  { %v93_v27 = vpop.permute.xlu2 %92 }
  0x7f   :  { %v126_v4 = vpop.permute.xlu1 %125  ;;  %v137_v5 = vpop.permute.xlu0 %136 }
  0x80   :  { %v84_v43 = vpop.permute.xlu2 %83 }
  0x87   :  { %v128_v12 = vpop.permute.xlu1 %127  ;;  %v139_v13 = vpop.permute.xlu0 %138 }
  0x88   :  { %v130_v15 = vsel %vm129_vm0, %v126_v4, %v128_v12  ;;  %v141_v16 = vsel %vm140_vm1, %v137_v5, %v139_v13  ;;  %v142_v17 = vsel %vm140_vm1, %v139_v13, %v137_v5  ;;  %v131_v19 = vsel %vm129_vm0, %v128_v12, %v126_v4  ;;  %v157_v4 = vld [vmem:[%s650_s2 + $0x20] sm:$0xff]  ;;  %v58_v5 = vpop.permute.xlu2 %57 }
  0x89   :  { %v145_v20 = vmul.f32 %v375_v9, %v141_v16  ;;  %v146_v21 = vmul.f32 %v376_v10, %v142_v17  ;;  %v134_v26 = vmul.f32 %v132_v14, %v130_v15  ;;  %v135_v28 = vmul.f32 %v133_v18, %v131_v19  ;;  %181 = vperm.xlu2 %373, %v157_v4   ;;  %v150_v16 = vld [vmem:[%s649_s1 + $0x18] sm:$0xff]  ;;  %v152_v17 = vld [vmem:[%s649_s1 + $0x28] sm:$0xff]  ;;  %v149_v18 = vld [vmem:[%s649_s1 + $0x10] sm:$0xff] }
  0x8a   :  { %v67_v9 = vperm.slane %v562_v11, 0  ;;  %v148_v11 = vld [vmem:[%s649_s1 + $0x8] sm:$0xff]  ;;  %s493_s1 = smov [#allocation7]  }
  0x8b   :  { %215 = vmatpush.msra.mxu0 %v145_v20  ;;  %340 = vmatpush.msra.mxu2 %v145_v20  ;;  %s294_s8 = sshll.u32 %s493_s1, 4  ;;  %s295_s8 = int_to_ptr.vmem [resolvable:$true] %s294_s8 }
  0x8c   :  { %250 = vmatpush.msra.mxu1 %v146_v21  ;;  %349 = vmatpush.msra.mxu3 %v146_v21 }
  0x8d   :  { %216 = vmatpush.msra.mxu0 %v134_v26  ;;  %341 = vmatpush.msra.mxu2 %v134_v26 }
  0x8e   :  { %251 = vmatpush.msra.mxu1 %v135_v28  ;;  %350 = vmatpush.msra.mxu3 %v135_v28 }
  0x8f   :  { %v106_v33 = vpop.permute.xlu1 %105  ;;  %217 = vmatpush.msra.mxu0 %v123_v29  ;;  %342 = vmatpush.msra.mxu2 %v123_v29  ;;  %v104_v34 = vpop.permute.xlu0 %103 }
  0x90   :  { %252 = vmatpush.msra.mxu1 %v124_v32  ;;  %351 = vmatpush.msra.mxu3 %v124_v32  ;;  %v108_v36 = vsel %vm107_vm3, %v104_v34, %v106_v33  ;;  %v109_v37 = vsel %vm107_vm3, %v106_v33, %v104_v34  ;;  %v167_v22 = vpop.permute.xlu2 %166 }
  0x91   :  { %v112_v38 = vmul.f32 %v110_v30, %v108_v36  ;;  %v113_v39 = vmul.f32 %v111_v31, %v109_v37 }
  0x93   :  { %218 = vmatpush.msra.mxu0 %v112_v38  ;;  %343 = vmatpush.msra.mxu2 %v112_v38 }
  0x94   :  { %253 = vmatpush.msra.mxu1 %v113_v39  ;;  %352 = vmatpush.msra.mxu3 %v113_v39 }
  0x95   :  { %219 = vmatpush.msra.mxu0 %v534_v0  ;;  %344 = vmatpush.msra.mxu2 %v534_v0 }
  0x96   :  { %254 = vmatpush.msra.mxu1 %v539_v1  ;;  %353 = vmatpush.msra.mxu3 %v539_v1 }
  0x97   :  { %v82_v46 = vpop.permute.xlu1 %81  ;;  %v95_v47 = vpop.permute.xlu0 %94 }
  0x98   :  { %v97_v49 = vsel %vm96_vm4, %v93_v27, %v95_v47  ;;  %v98_v50 = vsel %vm96_vm4, %v95_v47, %v93_v27  ;;  %v86_v51 = vsel %vm85_vm5, %v82_v46, %v84_v43  ;;  %v87_v52 = vsel %vm85_vm5, %v84_v43, %v82_v46 }
  0x99   :  { %v101_v53 = vmul.f32 %v99_v41, %v98_v50  ;;  %v102_v54 = vmul.f32 %v100_v42, %v97_v49  ;;  %v90_v55 = vmul.f32 %v88_v44, %v87_v52  ;;  %v91_v56 = vmul.f32 %v89_v45, %v86_v51 }
  0x9b   :  { %220 = vmatpush.msra.mxu0 %v101_v53  ;;  %345 = vmatpush.msra.mxu2 %v101_v53 }
  0x9c   :  { %255 = vmatpush.msra.mxu1 %v102_v54  ;;  %354 = vmatpush.msra.mxu3 %v102_v54 }
  0x9d   :  { %221 = vmatpush.msra.mxu0 %v90_v55  ;;  %346 = vmatpush.msra.mxu2 %v90_v55 }
  0x9e   :  { %256 = vmatpush.msra.mxu1 %v91_v56  ;;  %355 = vmatpush.msra.mxu3 %v91_v56 }
  0x9f   :  { %v73_v61 = vpop.permute.xlu1 %72  ;;  %v71_v62 = vpop.permute.xlu0 %70 }
  0xa0   :  { %v75_v0 = vsel %vm74_vm6, %v71_v62, %v73_v61  ;;  %v76_v1 = vsel %vm74_vm6, %v73_v61, %v71_v62 }
  0xa1   :  { %v79_v2 = vmul.f32 %v77_v57, %v76_v1  ;;  %v80_v3 = vmul.f32 %v78_v58, %v75_v0 }
  0xa3   :  { %222 = vmatpush.msra.mxu0 %v79_v2  ;;  %347 = vmatpush.msra.mxu2 %v79_v2 }
  0xa4   :  { %257 = vmatpush.msra.mxu1 %v80_v3  ;;  %356 = vmatpush.msra.mxu3 %v80_v3 }
  0xa7   :  { %v60_v10 = vpop.permute.xlu0 %59  ;;  %v162_v19 = vpop.permute.xlu1 %161 }
  0xa8   :  { %v64_v12 = vsel %vm63_vm7, %v58_v5, %v60_v10  ;;  %v65_v13 = vsel %vm63_vm7, %v60_v10, %v58_v5 }
  0xa9   :  { %v68_v14 = vmul.f32 %v66_v7, %v65_v13  ;;  %v69_v15 = vmul.f32 %v67_v9, %v64_v12 }
  0xab   :  { %223 = vmatpush.msra.mxu0 %v68_v14  ;;  %348 = vmatpush.msra.mxu2 %v68_v14 }
  0xac   :  { %258 = vmatpush.msra.mxu1 %v69_v15  ;;  %357 = vmatpush.msra.mxu3 %v69_v15 }
  0xad   :  { %331 = vmatmul.msk.f32.vlgmr.msra.gmra.mxu2 %vm189_vm8, %v150_v16  ;;  %337 = vmatmul.msk.f32.vlgmr.msra.gmra.mxu3 %vm189_vm8, %v150_v16 }
  0xae   :  { %328 = vmatmul.msk.f32.vlgmr.msra.gmra.mxu0 %vm189_vm8, %v147_v6  ;;  %334 = vmatmul.msk.f32.vlgmr.msra.gmra.mxu1 %vm189_vm8, %v147_v6 }
  0xaf   :  { %v177_v25 = vpop.permute.xlu1 %176  ;;  %v172_v39 = vpop.permute.xlu0 %171 }
  0xb5   :  { %332 = vmatmul.msk.f32.gmra.mxu2 %vm189_vm8, %v151_v8  ;;  %338 = vmatmul.msk.f32.gmra.mxu3 %vm189_vm8, %v151_v8 }
  0xb6   :  { %329 = vmatmul.msk.f32.gmra.mxu0 %vm189_vm8, %v148_v11  ;;  %335 = vmatmul.msk.f32.gmra.mxu1 %vm189_vm8, %v148_v11 }
  0xb7   :  { %v187_v44 = vpop.permute.xlu1 %186 }
  0xbd   :  { %333 = vmatmul.msk.f32.gmra.mxu2 %vm189_vm8, %v152_v17  ;;  %339 = vmatmul.msk.f32.gmra.mxu3 %vm189_vm8, %v152_v17 }
  0xbe   :  { %330 = vmatmul.msk.f32.gmra.mxu0 %vm189_vm8, %v149_v18  ;;  %336 = vmatmul.msk.f32.gmra.mxu1 %vm189_vm8, %v149_v18 }
  0xe3   :  { %v182_v34 = vpop.permute.xlu2 %181 }
 0x12b   :  { %v225_v20 = vpop.f32.mrf.mxu0  ;;  %v260_v21 = vpop.f32.mrf.mxu1 }
 0x12c   :  { %v226_v23 = vadd.f32 %v225_v20, %v162_v19  ;;  %v261_v24 = vadd.f32 %v260_v21, %v162_v19 }
 0x12e   :  { %278 = vst [vmem:[#allocation7] sm:$0xff] %v226_v23 }
 0x12f   :  { %279 = vst [vmem:[#allocation7 + $0x8] sm:$0xff] %v261_v24 }
 0x130   :  { %v234_v26 = vpop.f32.mrf.mxu2  ;;  %v269_v27 = vpop.f32.mrf.mxu3 }
 0x131   :  { %v235_v28 = vadd.f32 %v234_v26, %v177_v25  ;;  %v270_v29 = vadd.f32 %v269_v27, %v177_v25 }
 0x133   :  { %284 = vst [vmem:[#allocation8 + $0x10] sm:$0xff] %v235_v28  ;;  %v228_v30 = vpop.f32.mrf.mxu0  ;;  %v263_v31 = vpop.f32.mrf.mxu1 }
 0x134   :  { %285 = vst [vmem:[#allocation8 + $0x18] sm:$0xff] %v270_v29  ;;  %v229_v32 = vadd.f32 %v228_v30, %v167_v22  ;;  %v264_v33 = vadd.f32 %v263_v31, %v167_v22 }
 0x136   :  { %280 = vst [vmem:[#allocation7 + $0x10] sm:$0xff] %v229_v32 }
 0x137   :  { %281 = vst [vmem:[#allocation7 + $0x18] sm:$0xff] %v264_v33 }
 0x138   :  { %v237_v35 = vpop.f32.mrf.mxu2  ;;  %v272_v36 = vpop.f32.mrf.mxu3  ;;  %302 = dma.vmem_to_hbm [thread:$0]  %s295_s8, 512, %s297_s11, [#allocation4], %s483_s28, %s483_s28, %s484_s29  }
 0x139   :  { %v238_v37 = vadd.f32 %v237_v35, %v182_v34  ;;  %v273_v38 = vadd.f32 %v272_v36, %v182_v34 }
 0x13b   :  { %286 = vst [vmem:[#allocation8 + $0x20] sm:$0xff] %v238_v37  ;;  %v231_v40 = vpop.f32.mrf.mxu0  ;;  %v266_v41 = vpop.f32.mrf.mxu1 }
 0x13c   :  { %287 = vst [vmem:[#allocation8 + $0x28] sm:$0xff] %v273_v38  ;;  %v232_v42 = vadd.f32 %v231_v40, %v172_v39  ;;  %v267_v43 = vadd.f32 %v266_v41, %v172_v39 }
 0x13e   :  { %282 = vst [vmem:[#allocation8] sm:$0xff] %v232_v42 }
 0x13f   :  { %283 = vst [vmem:[#allocation8 + $0x8] sm:$0xff] %v267_v43 }
 0x140   :  { %v240_v45 = vpop.f32.mrf.mxu2  ;;  %v275_v46 = vpop.f32.mrf.mxu3 }
 0x141   :  { %v241_v47 = vadd.f32 %v240_v45, %v187_v44  ;;  %v276_v48 = vadd.f32 %v275_v46, %v187_v44 }
 0x143   :  { %288 = vst [vmem:[#allocation8 + $0x30] sm:$0xff] %v241_v47 }
 0x144   :  { %289 = vst [vmem:[#allocation8 + $0x38] sm:$0xff] %v276_v48 }
 0x145   :  { %315 = dma.vmem_to_hbm [thread:$0]  %s308_s12, 1024, %s310_s15, [#allocation9], %s483_s28, %s483_s28, %s484_s29  }
 0x146   :  { %477 = dma.done.wait [#allocation4], 512  }
 0x147   :  { %478 = vsyncadd [#allocation4], 4294966784 }
 0x148   :  { %479 = dma.done.wait [#allocation9], 1024  }
 0x149   :  { %480 = vsyncadd [#allocation9], 4294966272 }
 0x14a   :  { %324 = vsyncpa [#allocation3], 1 }
 0x14b   :  { %325 = vsyncpa [#allocation6], 1 }
 0x14c   :  { %326 = vsyncpa [#allocation4], 1 }
 0x14d   :  { %327 = vsyncpa [#allocation9], 1 }

</bundles_post_ra>
